<compile_context>
chip_gen: v6e
topology: v6e:2x2x1
jax: 0.10.0
libtpu: 0.0.40
codegen_flags: <defaults>
</compile_context>

<pallas_src>
import functools

import jax
import jax.numpy as jnp
from jax import lax
from jax.experimental import pallas as pl
from jax.experimental.pallas import tpu as pltpu


def _round_up(x, m):
    return ((x + m - 1) // m) * m


def _focal_kernel(x_ref, t_ref, psum_ref, pcnt_ref, acc_s, acc_c, *,
                  gamma, ignore_index):
    si = pl.program_id(1)

    @pl.when(si == 0)
    def _():
        acc_s[...] = jnp.zeros_like(acc_s)
        acc_c[...] = jnp.zeros_like(acc_c)

    x = x_ref[...].astype(jnp.float32)        # (1, C, TS): channels on sublanes
    t = t_ref[...]                            # (1, 1, TS) int32

    # softmax statistics over the (small) channel/sublane axis
    m = jnp.max(x, axis=1, keepdims=True)                       # (1, 1, TS)
    s = jnp.sum(jnp.exp(x - m), axis=1, keepdims=True)          # (1, 1, TS)

    # gather the target-class logit via one-hot select + sublane sum
    cls = lax.broadcasted_iota(jnp.int32, x.shape, 1)           # (1, C, TS)
    x_t = jnp.sum(jnp.where(cls == t, x, 0.0), axis=1, keepdims=True)

    # per-pixel focal-NLL on rows only (no (C, TS) temporaries past this point)
    logp_t = (x_t - m) - jnp.log(s)                             # log p_t
    p_t = jnp.exp(logp_t)
    one_minus = 1.0 - p_t
    if float(gamma).is_integer():
        focal = lax.integer_pow(one_minus, int(gamma))
    else:
        focal = jnp.power(one_minus, jnp.float32(gamma))
    picked = focal * logp_t                                     # (1, 1, TS)

    valid = (t != ignore_index).astype(jnp.float32)             # (1, 1, TS)

    # pure-VPU elementwise accumulation; no per-step scalar reduction
    acc_s[...] += picked * valid
    acc_c[...] += valid

    @pl.when(si == pl.num_programs(1) - 1)
    def _():
        total_s = jnp.sum(acc_s[...])
        total_c = jnp.sum(acc_c[...])
        psum_ref[...] = total_s * jnp.ones_like(psum_ref)
        pcnt_ref[...] = total_c * jnp.ones_like(pcnt_ref)


def focal_loss_2d(inputs, targets, *, gamma=2, ignore_index=255,
                  target_block_bytes=2 * 1024 * 1024, max_tile_lanes=32768):
    """inputs: (N, C, H, W) float logits; targets: (N, H, W) int class ids."""
    N, C, H, W = inputs.shape
    S = H * W

    # Free reshapes of contiguous NCHW data: spatial axis last (lane axis).
    x = inputs.reshape(N, C, S)
    t = targets.reshape(N, 1, S).astype(jnp.int32)

    # Lane tile: multiple of 128, ~target_block_bytes of f32 logits per block.
    lanes = (target_block_bytes // (4 * C)) // 128 * 128
    tile_s = max(128, min(max_tile_lanes, lanes))
    tile_s = min(tile_s, _round_up(S, 128))
    S_pad = _round_up(S, tile_s)
    if S_pad != S:
        # Only when the spatial extent is not a multiple of the lane tile.
        # Padded pixels get ignore_index so they drop out of sum and count.
        x = jnp.pad(x, ((0, 0), (0, 0), (0, S_pad - S)))
        t = jnp.pad(t, ((0, 0), (0, 0), (0, S_pad - S)),
                    constant_values=ignore_index)

    grid = (N, S_pad // tile_s)
    kernel = functools.partial(_focal_kernel, gamma=gamma,
                               ignore_index=ignore_index)

    cost = pl.CostEstimate(
        flops=int(N * S_pad * (6 * C + 12)),
        transcendentals=int(N * S_pad * (C + 2)),
        bytes_accessed=int(N * S_pad * (C + 1) * 4 + 2 * N * 128 * 4),
    )

    psum, pcnt = pl.pallas_call(
        kernel,
        out_shape=(jax.ShapeDtypeStruct((N, 1, 128), jnp.float32),
                   jax.ShapeDtypeStruct((N, 1, 128), jnp.float32)),
        grid_spec=pltpu.PrefetchScalarGridSpec(
            num_scalar_prefetch=0,
            grid=grid,
            in_specs=[
                pl.BlockSpec((1, C, tile_s), lambda n, s: (n, 0, s)),
                pl.BlockSpec((1, 1, tile_s), lambda n, s: (n, 0, s)),
            ],
            out_specs=[
                pl.BlockSpec((1, 1, 128), lambda n, s: (n, 0, 0)),
                pl.BlockSpec((1, 1, 128), lambda n, s: (n, 0, 0)),
            ],
            scratch_shapes=[
                pltpu.VMEM((1, 1, tile_s), jnp.float32),   # masked focal-NLL sum
                pltpu.VMEM((1, 1, tile_s), jnp.float32),   # valid-pixel count
            ],
        ),
        compiler_params=pltpu.CompilerParams(
            dimension_semantics=("parallel", "arbitrary")),
        cost_estimate=cost,
    )(x, t)

    # Combine the tiny per-batch partials (one per TensorCore-sharded n).
    loss_sum = jnp.sum(psum[:, 0, 0])
    valid_cnt = jnp.sum(pcnt[:, 0, 0])
    # Note: if every pixel is ignored this is 0/0 = NaN, matching PyTorch.
    return -loss_sum / valid_cnt


def _reference(inputs, targets, *, gamma=2, ignore_index=255):
    logp = jax.nn.log_softmax(inputs, axis=1)
    p = jax.nn.softmax(inputs, axis=1)
    term = (1.0 - p) ** gamma * logp                       # (N, C, H, W)
    t = targets.astype(jnp.int32)
    safe_t = jnp.where(t == ignore_index, 0, t)
    picked = jnp.take_along_axis(term, safe_t[:, None, :, :], axis=1)[:, 0]
    valid = (t != ignore_index).astype(jnp.float32)
    return -jnp.sum(picked * valid) / jnp.sum(valid)


if __name__ == "__main__":
    key = jax.random.PRNGKey(0)
    k1, k2, k3 = jax.random.split(key, 3)

    N, C, H, W = 2, 4, 16, 16
    ignore_index = 255

    x = jax.random.normal(k1, (N, C, H, W), dtype=jnp.float32)
    t = jax.random.randint(k2, (N, H, W), 0, C, dtype=jnp.int32)
    # sprinkle some ignored pixels
    ign_mask = jax.random.bernoulli(k3, 0.1, (N, H, W))
    t = jnp.where(ign_mask, ignore_index, t)

    loss = focal_loss_2d(x, t, gamma=2, ignore_index=ignore_index)
    loss = jax.block_until_ready(loss)

    ref = _reference(x, t, gamma=2, ignore_index=ignore_index)
    assert jnp.allclose(loss, ref, rtol=1e-4, atol=1e-5), (loss, ref)

    print("KERNEL_OK")
</pallas_src>

<mosaic_0001>
module attributes {stable_mosaic.version = 11 : i64} {
  func.func @_focal_kernel(%arg0: i32, %arg1: i32, %arg2: memref<1x4x256xf32, #tpu.memory_space<vmem>>, %arg3: memref<1x1x256xi32, #tpu.memory_space<vmem>>, %arg4: memref<1x1x128xf32, #tpu.memory_space<vmem>>, %arg5: memref<1x1x128xf32, #tpu.memory_space<vmem>>, %arg6: memref<1x1x256xf32, #tpu.memory_space<vmem>>, %arg7: memref<1x1x256xf32, #tpu.memory_space<vmem>>) attributes {dimension_semantics = [#tpu.dimension_semantics<parallel>, #tpu.dimension_semantics<arbitrary>], iteration_bounds = array<i64: 2, 1>, scalar_prefetch = 0 : i64, scratch_operands = 2 : i64, tpu.core_type = #tpu.core_type<tc>, window_params = [{transform_indices = @transform_0, window_bounds = array<i64: 1, 4, 256>}, {transform_indices = @transform_1, window_bounds = array<i64: 1, 1, 256>}, {transform_indices = @transform_2, window_bounds = array<i64: 1, 1, 128>}, {transform_indices = @transform_3, window_bounds = array<i64: 1, 1, 128>}]} {
    %c0_i32 = arith.constant 0 : i32
    %0 = arith.cmpi eq, %arg1, %c0_i32 : i32
    %1 = arith.extui %0 : i1 to i32
    %c0_i32_0 = arith.constant 0 : i32
    %2 = arith.cmpi ne, %1, %c0_i32_0 : i32
    scf.if %2 {
      %cst_24 = arith.constant 0.000000e+00 : f32
      %41 = vector.broadcast %cst_24 : f32 to vector<1x1x256xf32>
      %c0_25 = arith.constant 0 : index
      %c0_26 = arith.constant 0 : index
      %c0_27 = arith.constant 0 : index
      %42 = vector.load %arg6[%c0_25, %c0_26, %c0_27] : memref<1x1x256xf32, #tpu.memory_space<vmem>>, vector<1x1x256xf32>
      tpu.vector_store %arg6[%c0_25, %c0_26, %c0_27], %41 {strides = array<i32>} : memref<1x1x256xf32, #tpu.memory_space<vmem>>, vector<1x1x256xf32>,
      %cst_28 = arith.constant 0.000000e+00 : f32
      %43 = vector.broadcast %cst_28 : f32 to vector<1x1x256xf32>
      %c0_29 = arith.constant 0 : index
      %c0_30 = arith.constant 0 : index
      %c0_31 = arith.constant 0 : index
      %44 = vector.load %arg7[%c0_29, %c0_30, %c0_31] : memref<1x1x256xf32, #tpu.memory_space<vmem>>, vector<1x1x256xf32>
      tpu.vector_store %arg7[%c0_29, %c0_30, %c0_31], %43 {strides = array<i32>} : memref<1x1x256xf32, #tpu.memory_space<vmem>>, vector<1x1x256xf32>,
    } else {
    }
    %c0 = arith.constant 0 : index
    %c0_1 = arith.constant 0 : index
    %c0_2 = arith.constant 0 : index
    %3 = vector.load %arg2[%c0, %c0_1, %c0_2] : memref<1x4x256xf32, #tpu.memory_space<vmem>>, vector<1x4x256xf32>
    %c0_3 = arith.constant 0 : index
    %c0_4 = arith.constant 0 : index
    %c0_5 = arith.constant 0 : index
    %4 = vector.load %arg3[%c0_3, %c0_4, %c0_5] : memref<1x1x256xi32, #tpu.memory_space<vmem>>, vector<1x1x256xi32>
    %cst = arith.constant dense<0xFF800000> : vector<1x256xf32>
    %5 = vector.multi_reduction <maximumf>, %3, %cst [1] : vector<1x4x256xf32> to vector<1x256xf32>
    %6 = vector.shape_cast %5 : vector<1x256xf32> to vector<1x1x256xf32>
    %7 = vector.broadcast %6 : vector<1x1x256xf32> to vector<1x4x256xf32>
    %8 = arith.subf %3, %7 : vector<1x4x256xf32>
    %9 = math.exp %8 : vector<1x4x256xf32>
    %cst_6 = arith.constant dense<0.000000e+00> : vector<1x256xf32>
    %10 = vector.multi_reduction <add>, %9, %cst_6 [1] : vector<1x4x256xf32> to vector<1x256xf32>
    %11 = vector.shape_cast %10 : vector<1x256xf32> to vector<1x1x256xf32>
    %12 = tpu.iota {dimensions = array<i32: 1>} : vector<1x4x256xi32>
    %13 = vector.broadcast %4 : vector<1x1x256xi32> to vector<1x4x256xi32>
    %14 = arith.cmpi eq, %12, %13 : vector<1x4x256xi32>
    %cst_7 = arith.constant 0.000000e+00 : f32
    %15 = vector.broadcast %cst_7 : f32 to vector<1x4x256xf32>
    %16 = arith.select %14, %3, %15 : vector<1x4x256xi1>, vector<1x4x256xf32>
    %cst_8 = arith.constant dense<0.000000e+00> : vector<1x256xf32>
    %17 = vector.multi_reduction <add>, %16, %cst_8 [1] : vector<1x4x256xf32> to vector<1x256xf32>
    %18 = vector.shape_cast %17 : vector<1x256xf32> to vector<1x1x256xf32>
    %19 = arith.subf %18, %6 : vector<1x1x256xf32>
    %20 = math.log %11 : vector<1x1x256xf32>
    %21 = arith.subf %19, %20 : vector<1x1x256xf32>
    %22 = math.exp %21 : vector<1x1x256xf32>
    %cst_9 = arith.constant 1.000000e+00 : f32
    %23 = vector.broadcast %cst_9 : f32 to vector<1x1x256xf32>
    %24 = arith.subf %23, %22 : vector<1x1x256xf32>
    %25 = arith.mulf %24, %24 : vector<1x1x256xf32>
    %26 = arith.mulf %25, %21 : vector<1x1x256xf32>
    %c255_i32 = arith.constant 255 : i32
    %27 = vector.broadcast %c255_i32 : i32 to vector<1x1x256xi32>
    %28 = arith.cmpi ne, %4, %27 : vector<1x1x256xi32>
    %29 = arith.extui %28 : vector<1x1x256xi1> to vector<1x1x256xi32>
    %30 = arith.sitofp %29 : vector<1x1x256xi32> to vector<1x1x256xf32>
    %c0_10 = arith.constant 0 : index
    %c0_11 = arith.constant 0 : index
    %c0_12 = arith.constant 0 : index
    %31 = vector.load %arg6[%c0_10, %c0_11, %c0_12] : memref<1x1x256xf32, #tpu.memory_space<vmem>>, vector<1x1x256xf32>
    %32 = arith.mulf %26, %30 : vector<1x1x256xf32>
    %33 = arith.addf %31, %32 : vector<1x1x256xf32>
    %c0_13 = arith.constant 0 : index
    %c0_14 = arith.constant 0 : index
    %c0_15 = arith.constant 0 : index
    %34 = vector.load %arg6[%c0_13, %c0_14, %c0_15] : memref<1x1x256xf32, #tpu.memory_space<vmem>>, vector<1x1x256xf32>
    tpu.vector_store %arg6[%c0_13, %c0_14, %c0_15], %33 {strides = array<i32>} : memref<1x1x256xf32, #tpu.memory_space<vmem>>, vector<1x1x256xf32>,
    %c0_16 = arith.constant 0 : index
    %c0_17 = arith.constant 0 : index
    %c0_18 = arith.constant 0 : index
    %35 = vector.load %arg7[%c0_16, %c0_17, %c0_18] : memref<1x1x256xf32, #tpu.memory_space<vmem>>, vector<1x1x256xf32>
    %36 = arith.addf %35, %30 : vector<1x1x256xf32>
    %c0_19 = arith.constant 0 : index
    %c0_20 = arith.constant 0 : index
    %c0_21 = arith.constant 0 : index
    %37 = vector.load %arg7[%c0_19, %c0_20, %c0_21] : memref<1x1x256xf32, #tpu.memory_space<vmem>>, vector<1x1x256xf32>
    tpu.vector_store %arg7[%c0_19, %c0_20, %c0_21], %36 {strides = array<i32>} : memref<1x1x256xf32, #tpu.memory_space<vmem>>, vector<1x1x256xf32>,
    %c0_i32_22 = arith.constant 0 : i32
    %38 = arith.cmpi eq, %arg1, %c0_i32_22 : i32
    %39 = arith.extui %38 : i1 to i32
    %c0_i32_23 = arith.constant 0 : i32
    %40 = arith.cmpi ne, %39, %c0_i32_23 : i32
    scf.if %40 {
      %c0_24 = arith.constant 0 : index
      %c0_25 = arith.constant 0 : index
      %c0_26 = arith.constant 0 : index
      %41 = vector.load %arg6[%c0_24, %c0_25, %c0_26] : memref<1x1x256xf32, #tpu.memory_space<vmem>>, vector<1x1x256xf32>
      %42 = vector.shape_cast %41 : vector<1x1x256xf32> to vector<1x1x1x256xf32>
      %cst_27 = arith.constant dense<0.000000e+00> : vector<1xf32>
      %43 = vector.multi_reduction <add>, %42, %cst_27 [1, 2, 3] : vector<1x1x1x256xf32> to vector<1xf32>
      %44 = vector.shape_cast %43 : vector<1xf32> to vector<1x1x1x1xf32>
      %45 = vector.extract %44[0, 0, 0, 0] : f32 from vector<1x1x1x1xf32>
      %c0_28 = arith.constant 0 : index
      %c0_29 = arith.constant 0 : index
      %c0_30 = arith.constant 0 : index
      %46 = vector.load %arg7[%c0_28, %c0_29, %c0_30] : memref<1x1x256xf32, #tpu.memory_space<vmem>>, vector<1x1x256xf32>
      %47 = vector.shape_cast %46 : vector<1x1x256xf32> to vector<1x1x1x256xf32>
      %cst_31 = arith.constant dense<0.000000e+00> : vector<1xf32>
      %48 = vector.multi_reduction <add>, %47, %cst_31 [1, 2, 3] : vector<1x1x1x256xf32> to vector<1xf32>
      %49 = vector.shape_cast %48 : vector<1xf32> to vector<1x1x1x1xf32>
      %50 = vector.extract %49[0, 0, 0, 0] : f32 from vector<1x1x1x1xf32>
      %cst_32 = arith.constant 1.000000e+00 : f32
      %51 = vector.broadcast %cst_32 : f32 to vector<1x1x128xf32>
      %52 = vector.broadcast %45 : f32 to vector<1x1x128xf32>
      %53 = arith.mulf %52, %51 : vector<1x1x128xf32>
      %c0_33 = arith.constant 0 : index
      %c0_34 = arith.constant 0 : index
      %c0_35 = arith.constant 0 : index
      %54 = vector.load %arg4[%c0_33, %c0_34, %c0_35] : memref<1x1x128xf32, #tpu.memory_space<vmem>>, vector<1x1x128xf32>
      tpu.vector_store %arg4[%c0_33, %c0_34, %c0_35], %53 {strides = array<i32>} : memref<1x1x128xf32, #tpu.memory_space<vmem>>, vector<1x1x128xf32>,
      %cst_36 = arith.constant 1.000000e+00 : f32
      %55 = vector.broadcast %cst_36 : f32 to vector<1x1x128xf32>
      %56 = vector.broadcast %50 : f32 to vector<1x1x128xf32>
      %57 = arith.mulf %56, %55 : vector<1x1x128xf32>
      %c0_37 = arith.constant 0 : index
      %c0_38 = arith.constant 0 : index
      %c0_39 = arith.constant 0 : index
      %58 = vector.load %arg5[%c0_37, %c0_38, %c0_39] : memref<1x1x128xf32, #tpu.memory_space<vmem>>, vector<1x1x128xf32>
      tpu.vector_store %arg5[%c0_37, %c0_38, %c0_39], %57 {strides = array<i32>} : memref<1x1x128xf32, #tpu.memory_space<vmem>>, vector<1x1x128xf32>,
    } else {
    }
    return
  }
  func.func @transform_0(%arg0: i32, %arg1: i32) -> (i32, i32, i32) {
    %c0_i32 = arith.constant 0 : i32
    %c0_i32_0 = arith.constant 0 : i32
    return %arg0, %c0_i32, %arg1 : i32, i32, i32
  }
  func.func @transform_1(%arg0: i32, %arg1: i32) -> (i32, i32, i32) {
    %c0_i32 = arith.constant 0 : i32
    %c0_i32_0 = arith.constant 0 : i32
    return %arg0, %c0_i32, %arg1 : i32, i32, i32
  }
  func.func @transform_2(%arg0: i32, %arg1: i32) -> (i32, i32, i32) {
    %c0_i32 = arith.constant 0 : i32
    %c0_i32_0 = arith.constant 0 : i32
    %c0_i32_1 = arith.constant 0 : i32
    return %arg0, %c0_i32, %c0_i32_0 : i32, i32, i32
  }
  func.func @transform_3(%arg0: i32, %arg1: i32) -> (i32, i32, i32) {
    %c0_i32 = arith.constant 0 : i32
    %c0_i32_0 = arith.constant 0 : i32
    %c0_i32_1 = arith.constant 0 : i32
    return %arg0, %c0_i32, %c0_i32_0 : i32, i32, i32
  }
}

</mosaic_0001>

<bundles_post_ra>
// kernel: tpu_custom_call.1
= control target key start
LH: loop header
LB: loop body
LE: loop exit
PB: predicated region body
PF: predicated region fallthrough
CT: control target
= control target key end

     0   :  { %9 = vsyncpa [#allocation5], 0  ;;  %s1174_s0 = inlined_call_operand.hbm [shape: f32[2,4,256], index: 0, kind: input, shape index: {}]   ;;  %s1175_s1 = inlined_call_operand.hbm [shape: s32[2,1,256], index: 1, kind: input, shape index: {}]   ;;  %s1176_s2 = inlined_call_operand.hbm [shape: f32[2,1,128], index: 2, kind: output, shape index: {0}]   ;;  %s1177_s3 = inlined_call_operand.hbm [shape: f32[2,1,128], index: 3, kind: output, shape index: {1}]  }
   0x1   :  { %11 = vsyncpa [#allocation5 + $0x1], 0 }
   0x2   :  { %12 = vsyncpa [#allocation8], 0 }
   0x3   :  { %14 = vsyncpa [#allocation8 + $0x1], 0 }
   0x4   :  { %15 = vsyncpa [#allocation6], 0 }
   0x5   :  { %17 = vsyncpa [#allocation6 + $0x1], 0 }
   0x6   :  { %18 = vsyncpa [#allocation11], 0 }
   0x7   :  { %20 = vsyncpa [#allocation11 + $0x1], 0  ;;  %s924_s12 = smov 0   ;;  %s926_s13 = smov 0  }
   0x8   :  { %s928_s14 = smov 0   ;;  %s930_s15 = smov 0  }
   0x9   :  { %s932_s16 = smov 0   ;;  %s934_s17 = smov 0  }
   0xa LB: > { %s617_s18 = sadd.s32 4294967295, %s896_s17   ;;  %s618_s19 = sadd.s32 4294967294, %s896_s17   ;;  %s896_s17 = sphi %s934_s17, %s26_s17   ;;  %s892_s16 = sphi %s932_s16, %s1191_s16   ;;  %s888_s15 = sphi %s930_s15, %s1190_s15   ;;  %s884_s14 = sphi %s928_s14, %s1189_s14   ;;  %s880_s13 = sphi %s926_s13, %s1188_s13   ;;  %s876_s12 = sphi %s924_s12, %s1187_s12  }
   0xb   : > { %s38_s20 = sadd.s32 1, %s892_s16  ;;  %s47_s21 = sadd.s32 1, %s884_s14 }
   0xc   : > { %p40_p0 = scmp.ge.s32.totalorder %s38_s20, 2  ;;  %p54_p1 = scmp.ne.s32.totalorder %s884_s14, %s880_s13 }
   0xd   : > { %p55_p2 = scmp.eq.s32.totalorder %s896_s17, 0  ;;  %p60_p3 = scmp.ne.s32.totalorder %s880_s13, %s876_s12 }
   0xe   : > { %s1193_s20 = smov (%p40_p0, %s38_s20), 0  ;;  %p61_p5 = scmp.eq.s32.totalorder %s617_s18, 0 }
   0xf   : > { %p965_p4 = por %p55_p2, %p54_p1  ;;  %s42_s23 = ssub.s32 %s892_s16, %s1193_s20 }
  0x10   : > { %p112_p6 = scmp.eq.s32.totalorder %s617_s18, 1  ;;  %p45_p7 = scmp.eq.s32.totalorder %s42_s23, 0 }
  0x11   : > { %p971_p8 = por %p61_p5, %p60_p3  ;;  %p118_p10 = scmp.eq.s32.totalorder %s618_s19, 1 }
  0x12   : > { %p975_p9 = por %p112_p6, %p54_p1  ;;  %p663_p13 = scmp.lt.s32.totalorder %s896_s17, 2 }
  0x13   : > { %s980_s26 = scalar_select %p45_p7, %s884_s14, %s47_s21  }
  0x14   : > { %p982_p11 = por %p118_p10, %p60_p3  ;;  %s989_s28 = sand.u32 1, %s884_s14  }
  0x15   : > { %s621_s29 = sshll.u32 %s989_s28, 3  ;;  %s635_s30 = sshll.u32 %s892_s16, 7 }
  0x16   : > { %s176_s6 = scalar_lea.hbm %s1174_s0, %s635_s30  ;;  %s168_s7 = scalar_lea.vmem [#allocation4], %s621_s29 }
  0x17   : > { %s178_s8 = sshll.u32 %s168_s7, 4  ;;  %p998_p0 = pnand %p663_p13, %p965_p4  ;;  %s179_s8 = int_to_ptr.vmem [resolvable:$true] %s178_s8 }
  0x18   : > { %p627_p1 = scmp.ge.s32.totalorder %s896_s17, 1  ;;  %p204_p2 = scmp.lt.s32.totalorder %s896_s17, 3 }
  0x19   : > { %s165_s10 = scalar_lea.sflag [#allocation5], %s989_s28  ;;  %p728_p3 = pneg %p998_p0 }
  0x1a   : > { %s739_s11 = scalar_lea.vmem %s179_s8, 128  ;;  %s898_s18 = smov [#allocation4]  }
  0x1b   : > { %p740_p5 = scmp.ne.s32.totalorder %s179_s8, %s739_s11  ;;  %s744_s19 = sshll.u32 %s898_s18, 4  ;;  %s745_s19 = int_to_ptr.vmem [resolvable:$false] %s744_s19 }
  0x1c   : > { %s746_s21 = scalar_lea.vmem %s745_s19, 256  ;;  %p747_p4 = scmp.lt.s32.totalorder %s179_s8, %s745_s19 }
  0x1d   : > { %p742_p6 = pnand %p740_p5, %p728_p3  ;;  %p748_p10 = scmp.lt.s32.totalorder %s746_s21, %s739_s11 }
  0x1f   : > { %p743_p7 = pneg %p742_p6  ;;  %p749_p13 = por %p748_p10, %p747_p4 }
  0x21   : > { %p750_p12 = pnand %p749_p13, %p743_p7 }
  0x23   : > { %753 = shalt.err (!%p750_p12)
}
  0x24   : > { %652 = dma.hbm_to_vmem [thread:$0]  (!%p998_p0), %s176_s6, 128, %s179_s8, %s165_s10  }
  0x25   : > { %p1016_p5 = pnand %p627_p1, %p204_p2  ;;  %s624_s23 = sshll.u32 %s989_s28, 1 }
  0x26   : > { %s636_s29 = sshll.u32 %s892_s16, 5  ;;  %s189_s7 = scalar_lea.vmem [#allocation7], %s624_s23 }
  0x27   : > { %s197_s5 = scalar_lea.hbm %s1175_s1, %s636_s29  ;;  %s199_s11 = sshll.u32 %s189_s7, 4  ;;  %s200_s11 = int_to_ptr.vmem [resolvable:$true] %s199_s11 }
  0x28   : > { %s186_s18 = scalar_lea.sflag [#allocation8], %s989_s28  ;;  %s767_s19 = scalar_lea.vmem %s200_s11, 32 }
  0x29   : > { %p768_p12 = scmp.ne.s32.totalorder %s200_s11, %s767_s19  ;;  %s899_s6 = smov [#allocation7]  }
  0x2a   : > { %s772_s8 = sshll.u32 %s899_s6, 4  ;;  %s773_s8 = int_to_ptr.vmem [resolvable:$false] %s772_s8 }
  0x2b   : > { %p770_p6 = pnand %p768_p12, %p728_p3  ;;  %s774_s10 = scalar_lea.vmem %s773_s8, 64 }
  0x2c   : > { %p775_p1 = scmp.lt.s32.totalorder %s200_s11, %s773_s8  ;;  %p776_p2 = scmp.lt.s32.totalorder %s774_s10, %s767_s19 }
  0x2d   : > { %p771_p7 = pneg %p770_p6 }
  0x2e   : > { %p777_p4 = por %p776_p2, %p775_p1 }
  0x30   : > { %p778_p10 = pnand %p777_p4, %p771_p7 }
  0x32   : > { %781 = shalt.err (!%p778_p10)
}
  0x33   : > { %655 = dma.hbm_to_vmem [thread:$0]  (!%p998_p0), %s197_s5, 32, %s200_s11, %s186_s18  }
  0x34   : > { %208 = sbr.rel (%p1016_p5) target bundleno = 412 (0x19c), region = 28  ;;  %s1034_s28 = sand.u32 (!%p1016_p5), 1, %s880_s13  }
  0x35   : > { %s628_s21 = sshll.u32 (!%p1016_p5), %s1034_s28, 3  ;;  %s211_s23 = scalar_lea.sflag (!%p1016_p5), [#allocation5], %s1034_s28 }
  0x36   : > { %s214_s29 = scalar_lea.vmem (!%p1016_p5), [#allocation4], %s628_s21 }
  0x39   : > { %859 = dma.done.wait (%p971_p8), %s211_s23, 128  }
  0x3a   : > { %861 = vsyncadd (%p971_p8), %s211_s23, 4294967168  ;;  %s629_s9 = sshll.u32 %s1034_s28, 1  ;;  %s220_s22 = scalar_lea.sflag [#allocation8], %s1034_s28 }
  0x3b   : > { %s223_s30 = scalar_lea.vmem [#allocation7], %s629_s9 }
  0x3c   : > { %863 = dma.done.wait (%p971_p8), %s220_s22, 32  }
  0x3d   : > { %865 = vsyncadd (%p971_p8), %s220_s22, 4294967264  ;;  %v260_v0 = vlaneseq  ;;  %v900_v2 = vmov 0.0   ;;  %vm271_vm1 = vcmask 1043456   ;;  %v266_v3 = vld [vmem:[%s214_s29] sm:$0xff]  ;;  %v267_v6 = vld [vmem:[%s223_s30] sm:$0x3] }
  0x3e   : > { %v269_v4 = vcombine.high %v266_v3, %v266_v3  ;;  %v272_v5 = vsel %vm271_vm1, %v266_v3, -inf  ;;  %vm356_vm2 = vcmp.ne.s32.totalorder %v267_v6, 255  ;;  %vm415_vm5 = vcmask 1040384   ;;  %s631_s24 = sshll.u32 %s888_s15, 4  ;;  %s247_s4 = scalar_lea.vmem [#allocation9], %s1034_s28 }
  0x3f   : > { %vm1048_vm0 = vcmp.lt.s32.totalorder %v260_v0, 256  ;;  %v273_v7 = vrot.slane %v272_v5, 4  ;;  %v1058_v14 = vsel %vm356_vm2, 1.0, %v900_v2  ;;  %v1063_v24 = vshrl.u32 %v260_v0, 7  ;;  %s473_s5 = sshll.u32 %s247_s4, 4  ;;  %s253_s7 = scalar_lea.vmem [#allocation10], %s1034_s28  ;;  %s1102_s5 = int_to_ptr.vmem [resolvable:$true] %s473_s5 }
  0x40   : > { %264 = vst.msk [vmem:[#allocation2] sm:$0x3] %vm1048_vm0, %v900_v2  ;;  %265 = vst.msk [vmem:[#allocation3] sm:$0x3] %vm1048_vm0, %v900_v2  ;;  %v279_v8 = vsel %vm271_vm1, %v269_v4, -inf  ;;  %s486_s11 = sshll.u32 %s253_s7, 4  ;;  %s1100_s6 = scalar_lea.hbm %s1176_s2, %s631_s24  ;;  %s1104_s11 = int_to_ptr.vmem [resolvable:$true] %s486_s11 }
  0x41   : > { %v274_v9 = vmax.f32 %v272_v5, %v273_v7  ;;  %v280_v10 = vrot.slane %v279_v8, 4  ;;  %v1066_v27 = vsub.s32 0, %v1063_v24  ;;  %v1069_v28 = vsub.s32 1, %v1063_v24  ;;  %s457_s10 = scalar_lea.sflag [#allocation6], %s1034_s28  ;;  %s782_s21 = scalar_lea.vmem %s1102_s5, 16 }
  0x42   : > { %p783_p8 = scmp.ne.s32.totalorder %s1102_s5, %s782_s21  ;;  %s902_s23 = smov [#allocation9]  }
  0x43   : > { %v275_v12 = vrot.slane %v274_v9, 2  ;;  %v281_v13 = vmax.f32 %v279_v8, %v280_v10  ;;  %v315_v29 = vrot.slane %v267_v6, %v1066_v27  ;;  %v319_v30 = vrot.slane %v267_v6, %v1069_v28  ;;  %s786_s29 = sshll.u32 %s902_s23, 4  ;;  %s787_s29 = int_to_ptr.vmem [resolvable:$false] %s786_s29 }
  0x44   : > { %p784_p0 = pnand %p783_p8, %p975_p9  ;;  %s788_s9 = scalar_lea.vmem %s787_s29, 32 }
  0x45   : > { %v276_v16 = vmax.f32 %v274_v9, %v275_v12  ;;  %v282_v17 = vrot.slane %v281_v13, 2  ;;  %vm320_vm3 = vcmp.eq.s32.totalorder %v1063_v24, %v315_v29  ;;  %vm321_vm4 = vcmp.eq.s32.totalorder %v1063_v24, %v319_v30  ;;  %p789_p13 = scmp.lt.s32.totalorder %s1102_s5, %s787_s29  ;;  %p790_p5 = scmp.lt.s32.totalorder %s788_s9, %s782_s21 }
  0x46   : > { %v322_v31 = vsel %vm320_vm3, %v266_v3, 0.0  ;;  %v323_v32 = vsel %vm321_vm4, %v269_v4, 0.0  ;;  %v901_v12 = vmov 1966171168   ;;  %p785_p3 = pneg %p784_p0 }
  0x47   : > { %v397_v11 = vld [vmem:[#allocation3] sm:$0x3]  ;;  %v277_v18 = vrot.slane %v276_v16, 1  ;;  %v283_v19 = vmax.f32 %v281_v13, %v282_v17  ;;  %v324_v33 = vsel %vm271_vm1, %v322_v31, 0.0  ;;  %v331_v37 = vsel %vm271_vm1, %v323_v32, 0.0  ;;  %p791_p12 = por %p790_p5, %p789_p13 }
  0x48   : > { %v398_v15 = vadd.f32 %v1058_v14, %v397_v11  ;;  %v325_v39 = vrot.slane %v324_v33, 4  ;;  %v332_v43 = vrot.slane %v331_v37, 4  ;;  %v377_v13 = vunpack.c.l.s4 %v901_v12  ;;  %v359_v32 = vld [vmem:[#allocation2] sm:$0x3] }
  0x49   : > { %v278_v20 = vmax.f32 %v276_v16, %v277_v18  ;;  %v284_v21 = vrot.slane %v283_v19, 1  ;;  %v364_v18 = vrot.slane %v1058_v14, %v1066_v27  ;;  %p792_p6 = pnand %p791_p12, %p785_p3 }
  0x4a   : > { %399 = vst.msk [vmem:[#allocation3] sm:$0x3] %vm1048_vm0, %v398_v15  ;;  %v326_v46 = vadd.f32 %v325_v39, %v324_v33  ;;  %v333_v49 = vadd.f32 %v332_v43, %v331_v37 }
  0x4b   : > { %v285_v22 = vmax.f32 %v283_v19, %v284_v21  ;;  %v368_v21 = vrot.slane %v1058_v14, %v1069_v28 }
  0x4c   : > { %v327_v52 = vrot.slane %v326_v46, 2  ;;  %v334_v55 = vrot.slane %v333_v49, 2 }
  0x4d   : > { %v288_v23 = vcombine.low %v278_v20, %v285_v22 }
  0x4e   : > { %v328_v57 = vadd.f32 %v327_v52, %v326_v46  ;;  %v335_v58 = vadd.f32 %v334_v55, %v333_v49 }
  0x4f   : > { %v290_v25 = vsub.f32 %v266_v3, %v288_v23 }
  0x50   : > { %v329_v59 = vrot.slane %v328_v57, 1  ;;  %v336_v60 = vrot.slane %v335_v58, 1 }
  0x51   : > { %v291_v26 = vmul.f32 1.442695, %v290_v25 }
  0x52   : > { %v330_v61 = vadd.f32 %v329_v59, %v328_v57  ;;  %v337_v62 = vadd.f32 %v336_v60, %v335_v58 }
  0x53   : > { %716 = vpow2.f32 %v291_v26 }
  0x54   : > { %v338_v63 = vsub.f32 %v330_v61, %v278_v20  ;;  %v339_v2 = vsub.f32 %v337_v62, %v285_v22  ;;  %v378_v22 = vunpack.c.0.s8 %v377_v13 }
  0x56   : > { %v381_v29 = vsub.s32 %v378_v22, %v1063_v24 }
  0x60   : > { %v717_v34 = vpop.eup %716 }
  0x61   : > { %v294_v35 = vcombine.high %v717_v34, %v717_v34  ;;  %v296_v36 = vsel %vm271_vm1, %v717_v34, 0.0 }
  0x62   : > { %v297_v38 = vrot.slane %v296_v36, 4 }
  0x63   : > { %v303_v40 = vsel %vm271_vm1, %v294_v35, 0.0  ;;  %v428_v35 = vld [vmem:[#allocation3] sm:$0x3] }
  0x64   : > { %v298_v41 = vadd.f32 %v297_v38, %v296_v36  ;;  %v304_v42 = vrot.slane %v303_v40, 4  ;;  %v433_v36 = vrot.slane %v428_v35, %v1066_v27  ;;  %v437_v37 = vrot.slane %v428_v35, %v1069_v28 }
  0x66   : > { %v299_v44 = vrot.slane %v298_v41, 2  ;;  %v305_v45 = vadd.f32 %v304_v42, %v303_v40  ;;  %v441_v42 = vsel %vm415_vm5, %v437_v37, 0.0 }
  0x68   : > { %v300_v47 = vadd.f32 %v299_v44, %v298_v41  ;;  %v306_v48 = vrot.slane %v305_v45, 2  ;;  %v440_v41 = vsel %vm415_vm5, %v433_v36, 0.0 }
  0x69   : > { %v442_v44 = vadd.f32 %v441_v42, %v440_v41 }
  0x6a   : > { %v301_v50 = vrot.slane %v300_v47, 1  ;;  %v307_v51 = vadd.f32 %v306_v48, %v305_v45 }
  0x6c   : > { %v302_v53 = vadd.f32 %v301_v50, %v300_v47  ;;  %v308_v54 = vrot.slane %v307_v51, 1 }
  0x6e   : > { %v309_v56 = vadd.f32 %v308_v54, %v307_v51  ;;  %718 = vlog2.f32 %v302_v53 }
  0x70   : > { %720 = vlog2.f32 %v309_v56 }
  0x7b   : > { %v719_v0 = vpop.eup %718 }
  0x7c   : > { %v341_v3 = vmul.f32 0.6931472, %v719_v0 }
  0x7d   : > { %v721_v4 = vpop.eup %720 }
  0x7e   : > { %v343_v5 = vmul.f32 0.6931472, %v721_v4  ;;  %v344_v6 = vsub.f32 %v338_v63, %v341_v3 }
  0x80   : > { %v345_v7 = vsub.f32 %v339_v2, %v343_v5  ;;  %v346_v8 = vmul.f32 1.442695, %v344_v6 }
  0x82   : > { %722 = vpow2.f32 %v346_v8  ;;  %v348_v9 = vmul.f32 1.442695, %v345_v7 }
  0x84   : > { %724 = vpow2.f32 %v348_v9 }
  0x8f   : > { %v723_v10 = vpop.eup %722 }
  0x90   : > { %v350_v11 = vsub.f32 1.0, %v723_v10 }
  0x91   : > { %v725_v15 = vpop.eup %724 }
  0x92   : > { %v351_v16 = vsub.f32 1.0, %v725_v15  ;;  %v352_v17 = vmul.f32 %v350_v11, %v350_v11 }
  0x94   : > { %v353_v19 = vmul.f32 %v351_v16, %v351_v16  ;;  %v354_v20 = vmul.f32 %v352_v17, %v344_v6 }
  0x96   : > { %v355_v23 = vmul.f32 %v353_v19, %v345_v7  ;;  %v371_v25 = vmul.f32 %v364_v18, %v354_v20 }
  0x98   : > { %v372_v26 = vmul.f32 %v368_v21, %v355_v23 }
  0x9a   : > { %v375_v30 = vcombine.low %v371_v25, %v372_v26 }
  0x9c   : > { %v382_v31 = vrot.slane %v375_v30, %v381_v29 }
  0x9e   : > { %v389_v33 = vrot.slane %v382_v31, %v381_v29 }
  0xa0   : > { %v391_v34 = vadd.f32 %v389_v33, %v359_v32 }
  0xa2   : > { %396 = vst.msk [vmem:[#allocation2] sm:$0x3] %vm1048_vm0, %v391_v34 }
  0xa9   : > { %v403_v14 = vld [vmem:[#allocation2] sm:$0x3] }
  0xaa   : > { %v408_v38 = vrot.slane %v403_v14, %v1066_v27  ;;  %v412_v39 = vrot.slane %v403_v14, %v1069_v28 }
  0xac   : > { %v416_v24 = vsel %vm415_vm5, %v408_v38, 0.0  ;;  %v417_v40 = vsel %vm415_vm5, %v412_v39, 0.0 }
  0xad   : > { %v418_v43 = vadd.f32 %v417_v40, %v416_v24 }
  0xaf   : > { %419 = vadd.xlane.f32.xlu0 %v418_v43 }
  0xb3   : > { %443 = vadd.xlane.f32.xlu0 %v442_v44 }
 0x138   : > { %v420_v1 = vpop.xlane.xlu0 %419 }
 0x139   : > { %v421_v45 = vrot.slane %v420_v1, 4 }
 0x13b   : > { %v422_v46 = vadd.f32 %v421_v45, %v420_v1 }
 0x13c   : > { %v444_v47 = vpop.xlane.xlu0 %443 }
 0x13d   : > { %v423_v48 = vrot.slane %v422_v46, 2  ;;  %v445_v27 = vrot.slane %v444_v47, 4 }
 0x13f   : > { %v446_v28 = vadd.f32 %v445_v27, %v444_v47  ;;  %v424_v49 = vadd.f32 %v423_v48, %v422_v46 }
 0x141   : > { %v447_v50 = vrot.slane %v446_v28, 2  ;;  %v425_v51 = vrot.slane %v424_v49, 1 }
 0x143   : > { %v448_v52 = vadd.f32 %v447_v50, %v446_v28  ;;  %v426_v53 = vadd.f32 %v425_v51, %v424_v49 }
 0x145   : > { %637 = vpush %v426_v53  ;;  %v449_v54 = vrot.slane %v448_v52, 1 }
 0x147   : > { %v450_v55 = vadd.f32 %v449_v54, %v448_v52 }
 0x149   : > { %639 = vpush %v450_v55 }
 0x176   : > { %s638_s8 = spop %637 }
 0x177   : > { %v452_v56 = vstv %s638_s8 }
 0x178   : > { %453 = vst [vmem:[%s247_s4] sm:$0x1] %v452_v56 }
 0x179   : > { %795 = shalt.err (!%p792_p6)
}
 0x17a   : > { %s796_s22 = scalar_lea.hbm %s1100_s6, 16  ;;  %s800_s18 = scalar_lea.hbm %s1176_s2, 32 }
 0x17b   : > { %p797_p7 = scmp.ne.s32.totalorder %s1100_s6, %s796_s22  ;;  %p801_p4 = scmp.lt.s32.totalorder %s1100_s6, %s1176_s2 }
 0x17c   : > { %p802_p10 = scmp.lt.s32.totalorder %s800_s18, %s796_s22 }
 0x17d   : > { %p798_p1 = pnand %p797_p7, %p975_p9 }
 0x17e   : > { %p803_p8 = por %p802_p10, %p801_p4 }
 0x17f   : > { %p799_p2 = pneg %p798_p1 }
 0x181   : > { %p804_p0 = pnand %p803_p8, %p799_p2 }
 0x183   : > { %807 = shalt.err (!%p804_p0)
}
 0x184   : > { %645 = dma.vmem_to_hbm [thread:$0]  (%p975_p9), %s1102_s5, 16, %s1100_s6, %s457_s10  }
 0x185   : > { %s640_s21 = spop %639  ;;  %s484_s9 = scalar_lea.hbm %s1177_s3, %s631_s24 }
 0x186   : > { %v454_v57 = vstv %s640_s21  ;;  %s461_s22 = scalar_lea.sflag [#allocation11], %s1034_s28  ;;  %s808_s30 = scalar_lea.vmem %s1104_s11, 16 }
 0x187   : > { %455 = vst [vmem:[%s253_s7] sm:$0x1] %v454_v57  ;;  %p809_p3 = scmp.ne.s32.totalorder %s1104_s11, %s808_s30  ;;  %s903_s4 = smov [#allocation10]  }
 0x188   : > { %s812_s18 = sshll.u32 %s903_s4, 4  ;;  %s813_s18 = int_to_ptr.vmem [resolvable:$false] %s812_s18 }
 0x189   : > { %p810_p13 = pnand %p809_p3, %p975_p9  ;;  %s814_s19 = scalar_lea.vmem %s813_s18, 32 }
 0x18a   : > { %p815_p12 = scmp.lt.s32.totalorder %s1104_s11, %s813_s18  ;;  %p816_p6 = scmp.lt.s32.totalorder %s814_s19, %s808_s30 }
 0x18b   : > { %p811_p5 = pneg %p810_p13 }
 0x18c   : > { %p817_p7 = por %p816_p6, %p815_p12 }
 0x18e   : > { %p818_p1 = pnand %p817_p7, %p811_p5 }
 0x190   : > { %821 = shalt.err (!%p818_p1)
}
 0x191   : > { %s822_s15 = scalar_lea.hbm %s484_s9, 16  ;;  %s826_s5 = scalar_lea.hbm %s1177_s3, 32 }
 0x192   : > { %p823_p2 = scmp.ne.s32.totalorder %s484_s9, %s822_s15  ;;  %p827_p8 = scmp.lt.s32.totalorder %s484_s9, %s1177_s3 }
 0x193   : > { %p828_p0 = scmp.lt.s32.totalorder %s826_s5, %s822_s15 }
 0x194   : > { %p824_p4 = pnand %p823_p2, %p975_p9 }
 0x195   : > { %p829_p3 = por %p828_p0, %p827_p8 }
 0x196   : > { %p825_p10 = pneg %p824_p4 }
 0x198   : > { %p830_p13 = pnand %p829_p3, %p825_p10 }
 0x19a   : > { %833 = shalt.err (!%p830_p13)
}
 0x19b   : > { %646 = dma.vmem_to_hbm [thread:$0]  (%p975_p9), %s1104_s11, 16, %s484_s9, %s461_s22  }
 0x19c PF: > { %s498_s10 = sand.u32 1, %s876_s12   ;;  %p1186_p5 = scmp.ge.s32.totalorder %s896_s17, 2 }
 0x19d   : > { %s499_s8 = scalar_lea.sflag [#allocation6], %s498_s10 }
 0x19e   : > { %p657_p12 = pnand %p1186_p5, %p982_p11 }
 0x1a0   : > { %p658_p6 = pneg %p657_p12 }
 0x1a2   : > { %867 = dma.done.wait (%p658_p6), %s499_s8, 16  }
 0x1a3   : > { %869 = vsyncadd (%p658_p6), %s499_s8, 4294967280  ;;  %s507_s21 = scalar_lea.sflag [#allocation11], %s498_s10 }
 0x1a4   : > { %871 = dma.done.wait (%p658_p6), %s507_s21, 16  }
 0x1a5   : > { %873 = vsyncadd (%p658_p6), %s507_s21, 4294967280  ;;  %s26_s17 = sadd.s32 1, %s896_s17   ;;  %s1187_s12 = smov %s880_s13 }
 0x1a6   : > { %p23_p7 = scmp.ge.s32.totalorder %s26_s17, 4   ;;  %s1188_s13 = smov %s884_s14 }
 0x1a7   : > { %s1189_s14 = smov %s980_s26  ;;  %s1190_s15 = smov %s892_s16 }
 0x1a8   : > { %s1191_s16 = smov %s1193_s20  ;;  %25 = sbr.rel (!%p23_p7) target bundleno = 10 (0xa), region = 111 }
 0x1ad   :  { %511 = vsyncpa [#allocation5], 1 }
 0x1ae   :  { %513 = vsyncpa [#allocation5 + $0x1], 1 }
 0x1af   :  { %514 = vsyncpa [#allocation8], 1 }
 0x1b0   :  { %516 = vsyncpa [#allocation8 + $0x1], 1 }
 0x1b1   :  { %517 = vsyncpa [#allocation6], 1 }
 0x1b2   :  { %519 = vsyncpa [#allocation6 + $0x1], 1 }
 0x1b3   :  { %520 = vsyncpa [#allocation11], 1 }
 0x1b4   :  { %522 = vsyncpa [#allocation11 + $0x1], 1 }

</bundles_post_ra>
